<compile_context>
chip_gen: v7x
topology: tpu7x:2x2x1
jax: 0.10.0
libtpu: 0.0.40
codegen_flags: <defaults>
</compile_context>

<pallas_src>
import functools

import jax
import jax.numpy as jnp
from jax.experimental import pallas as pl
from jax.experimental.pallas import tpu as pltpu


# ---------------------------------------------------------------------------
# Fused Pallas kernel: whole autoencoder forward for one batch tile.
# Feature-major layout: x_ref is (d_in, TB), weights are (dout, din),
# biases are (dout, 1), outputs are (d_latent, TB) / (d_out, TB).
# ---------------------------------------------------------------------------
def _fused_ae_kernel(*refs, n_enc, n_dec, matmul_dtype):
    n_layers = n_enc + n_dec
    x_ref = refs[0]
    param_refs = refs[1:1 + 2 * n_layers]
    z_ref = refs[1 + 2 * n_layers]
    xhat_ref = refs[2 + 2 * n_layers]

    h = x_ref[...]                                         # (d_in, TB)
    for li in range(n_layers):
        w = param_refs[2 * li][...]                        # (dout, din), pre-cast
        b = param_refs[2 * li + 1][...].astype(jnp.float32)  # (dout, 1)
        # MXU: (dout, din) @ (din, TB) -> (dout, TB); lane dim = batch tile.
        acc = jnp.dot(w, h.astype(matmul_dtype),
                      preferred_element_type=jnp.float32)
        acc = acc + b                                       # lane-broadcast bias
        if li == n_layers - 1:
            h = jax.nn.sigmoid(acc)                         # final decoder: Sigmoid
        else:
            h = jnp.maximum(acc, 0.0)                       # ReLU
        if li == n_enc - 1:
            z_ref[...] = h.astype(z_ref.dtype)              # latent code
    xhat_ref[...] = h.astype(xhat_ref.dtype)


def _round_up(x, m):
    return ((x + m - 1) // m) * m


def _pick_batch_tile(batch, cap=2048):
    """Lane-axis batch tile: multiple of 128; >=2 grid steps when possible
    so both v7x TensorCores get work (cap amortizes the ~0.35us/step cost)."""
    b128 = _round_up(max(batch, 1), 128)
    if b128 <= 128:
        return 128
    half = max(128, ((b128 // 2) // 128) * 128)
    return min(cap, half)


# ---------------------------------------------------------------------------
# Wrapper: one pallas_call for the whole forward pass.
# ---------------------------------------------------------------------------
def dense_autoencoder_forward(x, enc_params, dec_params, *,
                              matmul_dtype=jnp.float32, batch_tile=None,
                              single_buffer_params=None):
    """Returns (z, x_hat) = DenseAutoencoder(widths).forward(x).

    x: (B, d_in).  enc_params / dec_params: lists of (W, b) with W in PyTorch
    (out_features, in_features) layout and b of shape (out_features, 1).
    """
    assert x.ndim == 2
    B, d_in = x.shape
    n_enc, n_dec = len(enc_params), len(dec_params)
    params = list(enc_params) + list(dec_params)
    d_latent = params[n_enc - 1][0].shape[0]
    d_out = params[-1][0].shape[0]

    TB = batch_tile if batch_tile is not None else _pick_batch_tile(B)
    B_pad = _round_up(B, TB)
    grid = (B_pad // TB,)

    # Feature-major input: (d_in, B_pad), batch on the lane axis.
    xT = x.T
    if B_pad != B:
        xT = jnp.pad(xT, ((0, 0), (0, B_pad - B)))

    # Pre-cast weights OUTSIDE the kernel (once per call / at init time for
    # training loops) so the kernel never casts weights per grid step.
    mm_itemsize = jnp.dtype(matmul_dtype).itemsize
    cast_params = []
    param_bytes = 0
    for (w, b) in params:
        if w.dtype != matmul_dtype:
            w = w.astype(matmul_dtype)
        cast_params.append((w, b))
        param_bytes += w.size * mm_itemsize + b.size * jnp.dtype(b.dtype).itemsize

    # Single-buffer the constant weight/bias blocks once they are big enough
    # to matter for VMEM (real AE widths); keep default double buffering for
    # tiny parameter footprints.
    if single_buffer_params is None:
        single_buffer_params = param_bytes > (2 << 20)

    def _const_spec(shape):
        if single_buffer_params:
            return pl.BlockSpec(shape, lambda i: (0, 0),
                                pipeline_mode=pl.Buffered(1))
        return pl.BlockSpec(shape, lambda i: (0, 0))

    # x is batch-tiled on lanes; weights/biases use constant index maps so
    # they are DMA'd once and stay VMEM-resident across all grid steps.
    in_specs = [pl.BlockSpec((d_in, TB), lambda i: (0, i))]
    flat_inputs = [xT]
    for (w, b) in cast_params:
        dout, din = w.shape
        in_specs.append(_const_spec((dout, din)))
        in_specs.append(_const_spec((dout, 1)))
        flat_inputs += [w, b]

    out_specs = (pl.BlockSpec((d_latent, TB), lambda i: (0, i)),
                 pl.BlockSpec((d_out, TB), lambda i: (0, i)))
    out_shape = (jax.ShapeDtypeStruct((d_latent, B_pad), x.dtype),
                 jax.ShapeDtypeStruct((d_out, B_pad), x.dtype))

    # Explicit VMEM budget (double-buffered x/outputs, weight buffers, live
    # f32 activations) with 2x headroom; floored at 32 MiB, capped below v7x
    # physical VMEM.
    act_itemsize = jnp.dtype(x.dtype).itemsize
    max_width = max([d_in] + [w.shape[0] for (w, _) in cast_params])
    buf_w = 1 if single_buffer_params else 2
    vmem_budget = (2 * TB * d_in * act_itemsize
                   + 2 * TB * (d_latent + d_out) * act_itemsize
                   + buf_w * param_bytes
                   + 3 * TB * max_width * 4)
    vmem_limit = int(min(100 * 2**20, max(2 * vmem_budget, 32 * 2**20)))

    # Advisory cost estimate for XLA's scheduler (sigmoid ~ exp + reciprocal).
    flops = 2 * B_pad * sum(w.shape[0] * w.shape[1] for (w, _) in cast_params)
    bytes_accessed = (param_bytes
                      + B_pad * d_in * act_itemsize
                      + B_pad * (d_latent + d_out) * act_itemsize)
    cost = pl.CostEstimate(flops=flops,
                           transcendentals=2 * B_pad * d_out,
                           bytes_accessed=bytes_accessed)

    kernel = functools.partial(_fused_ae_kernel, n_enc=n_enc, n_dec=n_dec,
                               matmul_dtype=matmul_dtype)

    zT, xhatT = pl.pallas_call(
        kernel,
        out_shape=out_shape,
        grid_spec=pltpu.PrefetchScalarGridSpec(
            num_scalar_prefetch=0,
            grid=grid,
            in_specs=in_specs,
            out_specs=out_specs,
        ),
        compiler_params=pltpu.CompilerParams(
            dimension_semantics=("parallel",),   # batch tiles shard across TCs
            vmem_limit_bytes=vmem_limit,
        ),
        cost_estimate=cost,
    )(*flat_inputs)

    # Cheap wrapper-side transpose back to (B, D) and drop batch padding.
    z = zT[:, :B].T
    x_hat = xhatT[:, :B].T
    return z, x_hat


# ---------------------------------------------------------------------------
# Parameter construction (deterministic, mimics nn.Linear's U(-k, k) init).
# Weights in PyTorch (out_features, in_features) layout; biases (out, 1).
# ---------------------------------------------------------------------------
def init_params(widths, key, dtype=jnp.float32):
    enc, dec = [], []
    n = len(widths) - 1
    keys = jax.random.split(key, 4 * n)
    ki = 0
    # encoder blocks: Linear(widths[i] -> widths[i+1]) + ReLU
    for i in range(n):
        fan_in, fan_out = widths[i], widths[i + 1]
        k = 1.0 / jnp.sqrt(fan_in)
        w = jax.random.uniform(keys[ki], (fan_out, fan_in), dtype, -k, k); ki += 1
        b = jax.random.uniform(keys[ki], (fan_out, 1), dtype, -k, k); ki += 1
        enc.append((w, b))
    # decoder blocks: Linear(widths[i+1] -> widths[i]) for i = n-1 .. 0
    for i in range(n)[::-1]:
        fan_in, fan_out = widths[i + 1], widths[i]
        k = 1.0 / jnp.sqrt(fan_in)
        w = jax.random.uniform(keys[ki], (fan_out, fan_in), dtype, -k, k); ki += 1
        b = jax.random.uniform(keys[ki], (fan_out, 1), dtype, -k, k); ki += 1
        dec.append((w, b))
    return enc, dec


# ---------------------------------------------------------------------------
# Pure-JAX reference (batch-major) for sanity checking.
# ---------------------------------------------------------------------------
def reference_forward(x, enc_params, dec_params):
    h = x
    for (w, b) in enc_params:
        h = jnp.maximum(h @ w.T + b[:, 0], 0.0)
    z = h
    n_dec = len(dec_params)
    for idx, (w, b) in enumerate(dec_params):
        pre = h @ w.T + b[:, 0]
        h = jax.nn.sigmoid(pre) if idx == n_dec - 1 else jnp.maximum(pre, 0.0)
    return z, h


if __name__ == "__main__":
    widths = [32, 16, 8]   # DenseAutoencoder(widths=[32, 16, 8])
    batch = 256            # -> 2 batch tiles of 128 lanes (both v7x TCs busy)

    key = jax.random.PRNGKey(0)
    key_x, key_p = jax.random.split(key)
    x = jax.random.uniform(key_x, (batch, widths[0]), jnp.float32)

    enc_params, dec_params = init_params(widths, key_p)
    z_ref, xhat_ref = reference_forward(x, enc_params, dec_params)

    # f32 MXU operands -> tight check against the f32 reference.
    fwd = jax.jit(dense_autoencoder_forward)
    z, x_hat = fwd(x, enc_params, dec_params)
    jax.block_until_ready((z, x_hat))

    assert z.shape == (batch, widths[-1])
    assert x_hat.shape == (batch, widths[0])
    assert jnp.allclose(z, z_ref, atol=1e-5, rtol=1e-5)
    assert jnp.allclose(x_hat, xhat_ref, atol=1e-5, rtol=1e-5)

    # bf16 MXU path (recommended on v6e/v7x): weights pre-cast outside the
    # kernel, f32 accumulation/bias/activations; looser tolerance.
    fwd_bf16 = jax.jit(functools.partial(dense_autoencoder_forward,
                                         matmul_dtype=jnp.bfloat16))
    z16, xhat16 = fwd_bf16(x, enc_params, dec_params)
    jax.block_until_ready((z16, xhat16))
    assert jnp.allclose(z16, z_ref, atol=5e-2, rtol=5e-2)
    assert jnp.allclose(xhat16, xhat_ref, atol=5e-2, rtol=5e-2)

    print("KERNEL_OK")
</pallas_src>

<mosaic_0001>
module attributes {stable_mosaic.version = 11 : i64} {
  func.func @_fused_ae_kernel(%arg0: i32, %arg1: memref<32x128xf32, #tpu.memory_space<vmem>>, %arg2: memref<16x32xf32, #tpu.memory_space<vmem>>, %arg3: memref<16x1xf32, #tpu.memory_space<vmem>>, %arg4: memref<8x16xf32, #tpu.memory_space<vmem>>, %arg5: memref<8x1xf32, #tpu.memory_space<vmem>>, %arg6: memref<16x8xf32, #tpu.memory_space<vmem>>, %arg7: memref<16x1xf32, #tpu.memory_space<vmem>>, %arg8: memref<32x16xf32, #tpu.memory_space<vmem>>, %arg9: memref<32x1xf32, #tpu.memory_space<vmem>>, %arg10: memref<8x128xf32, #tpu.memory_space<vmem>>, %arg11: memref<32x128xf32, #tpu.memory_space<vmem>>) attributes {dimension_semantics = [#tpu.dimension_semantics<parallel>], iteration_bounds = array<i64: 2>, scalar_prefetch = 0 : i64, scratch_operands = 0 : i64, tpu.core_type = #tpu.core_type<tc>, window_params = [{transform_indices = @transform_0, window_bounds = array<i64: 32, 128>}, {pipeline_mode = #tpu.pipeline_mode<synchronous>, transform_indices = @transform_1, window_bounds = array<i64: 16, 32>}, {pipeline_mode = #tpu.pipeline_mode<synchronous>, transform_indices = @transform_2, window_bounds = array<i64: 16, 1>}, {pipeline_mode = #tpu.pipeline_mode<synchronous>, transform_indices = @transform_3, window_bounds = array<i64: 8, 16>}, {pipeline_mode = #tpu.pipeline_mode<synchronous>, transform_indices = @transform_4, window_bounds = array<i64: 8, 1>}, {pipeline_mode = #tpu.pipeline_mode<synchronous>, transform_indices = @transform_5, window_bounds = array<i64: 16, 8>}, {pipeline_mode = #tpu.pipeline_mode<synchronous>, transform_indices = @transform_6, window_bounds = array<i64: 16, 1>}, {pipeline_mode = #tpu.pipeline_mode<synchronous>, transform_indices = @transform_7, window_bounds = array<i64: 32, 16>}, {pipeline_mode = #tpu.pipeline_mode<synchronous>, transform_indices = @transform_8, window_bounds = array<i64: 32, 1>}, {transform_indices = @transform_9, window_bounds = array<i64: 8, 128>}, {transform_indices = @transform_10, window_bounds = array<i64: 32, 128>}]} {
    %c0 = arith.constant 0 : index
    %c0_0 = arith.constant 0 : index
    %0 = vector.load %arg1[%c0, %c0_0] : memref<32x128xf32, #tpu.memory_space<vmem>>, vector<32x128xf32>
    %c0_1 = arith.constant 0 : index
    %c0_2 = arith.constant 0 : index
    %1 = vector.load %arg2[%c0_1, %c0_2] : memref<16x32xf32, #tpu.memory_space<vmem>>, vector<16x32xf32>
    %c0_3 = arith.constant 0 : index
    %c0_4 = arith.constant 0 : index
    %2 = vector.load %arg3[%c0_3, %c0_4] : memref<16x1xf32, #tpu.memory_space<vmem>>, vector<16x1xf32>
    %cst = arith.constant dense<0.000000e+00> : vector<16x128xf32>
    %3 = tpu.matmul %1, %0, %cst {dimension_numbers = #tpu.dot_dimension_numbers<[1], [0], [0], [1], [0, 0, 1, 1], [], []>} : vector<16x32xf32>, vector<32x128xf32>, vector<16x128xf32> -> vector<16x128xf32>
    %4 = vector.broadcast %2 : vector<16x1xf32> to vector<16x128xf32>
    %5 = arith.addf %3, %4 : vector<16x128xf32>
    %cst_5 = arith.constant 0.000000e+00 : f32
    %6 = vector.broadcast %cst_5 : f32 to vector<16x128xf32>
    %7 = arith.maximumf %5, %6 : vector<16x128xf32>
    %c0_6 = arith.constant 0 : index
    %c0_7 = arith.constant 0 : index
    %8 = vector.load %arg4[%c0_6, %c0_7] : memref<8x16xf32, #tpu.memory_space<vmem>>, vector<8x16xf32>
    %c0_8 = arith.constant 0 : index
    %c0_9 = arith.constant 0 : index
    %9 = vector.load %arg5[%c0_8, %c0_9] : memref<8x1xf32, #tpu.memory_space<vmem>>, vector<8x1xf32>
    %cst_10 = arith.constant dense<0.000000e+00> : vector<8x128xf32>
    %10 = tpu.matmul %8, %7, %cst_10 {dimension_numbers = #tpu.dot_dimension_numbers<[1], [0], [0], [1], [0, 0, 1, 1], [], []>} : vector<8x16xf32>, vector<16x128xf32>, vector<8x128xf32> -> vector<8x128xf32>
    %11 = vector.broadcast %9 : vector<8x1xf32> to vector<8x128xf32>
    %12 = arith.addf %10, %11 : vector<8x128xf32>
    %cst_11 = arith.constant 0.000000e+00 : f32
    %13 = vector.broadcast %cst_11 : f32 to vector<8x128xf32>
    %14 = arith.maximumf %12, %13 : vector<8x128xf32>
    %c0_12 = arith.constant 0 : index
    %c0_13 = arith.constant 0 : index
    %15 = vector.load %arg10[%c0_12, %c0_13] : memref<8x128xf32, #tpu.memory_space<vmem>>, vector<8x128xf32>
    tpu.vector_store %arg10[%c0_12, %c0_13], %14 {strides = array<i32>} : memref<8x128xf32, #tpu.memory_space<vmem>>, vector<8x128xf32>,
    %c0_14 = arith.constant 0 : index
    %c0_15 = arith.constant 0 : index
    %16 = vector.load %arg6[%c0_14, %c0_15] : memref<16x8xf32, #tpu.memory_space<vmem>>, vector<16x8xf32>
    %c0_16 = arith.constant 0 : index
    %c0_17 = arith.constant 0 : index
    %17 = vector.load %arg7[%c0_16, %c0_17] : memref<16x1xf32, #tpu.memory_space<vmem>>, vector<16x1xf32>
    %cst_18 = arith.constant dense<0.000000e+00> : vector<16x128xf32>
    %18 = tpu.matmul %16, %14, %cst_18 {dimension_numbers = #tpu.dot_dimension_numbers<[1], [0], [0], [1], [0, 0, 1, 1], [], []>} : vector<16x8xf32>, vector<8x128xf32>, vector<16x128xf32> -> vector<16x128xf32>
    %19 = vector.broadcast %17 : vector<16x1xf32> to vector<16x128xf32>
    %20 = arith.addf %18, %19 : vector<16x128xf32>
    %cst_19 = arith.constant 0.000000e+00 : f32
    %21 = vector.broadcast %cst_19 : f32 to vector<16x128xf32>
    %22 = arith.maximumf %20, %21 : vector<16x128xf32>
    %c0_20 = arith.constant 0 : index
    %c0_21 = arith.constant 0 : index
    %23 = vector.load %arg8[%c0_20, %c0_21] : memref<32x16xf32, #tpu.memory_space<vmem>>, vector<32x16xf32>
    %c0_22 = arith.constant 0 : index
    %c0_23 = arith.constant 0 : index
    %24 = vector.load %arg9[%c0_22, %c0_23] : memref<32x1xf32, #tpu.memory_space<vmem>>, vector<32x1xf32>
    %cst_24 = arith.constant dense<0.000000e+00> : vector<32x128xf32>
    %25 = tpu.matmul %23, %22, %cst_24 {dimension_numbers = #tpu.dot_dimension_numbers<[1], [0], [0], [1], [0, 0, 1, 1], [], []>} : vector<32x16xf32>, vector<16x128xf32>, vector<32x128xf32> -> vector<32x128xf32>
    %26 = vector.broadcast %24 : vector<32x1xf32> to vector<32x128xf32>
    %27 = arith.addf %25, %26 : vector<32x128xf32>
    %28 = arith.negf %27 : vector<32x128xf32>
    %29 = math.exp %28 : vector<32x128xf32>
    %cst_25 = arith.constant 1.000000e+00 : f32
    %30 = vector.broadcast %cst_25 : f32 to vector<32x128xf32>
    %31 = arith.addf %30, %29 : vector<32x128xf32>
    %32 = arith.divf %30, %31 : vector<32x128xf32>
    %c0_26 = arith.constant 0 : index
    %c0_27 = arith.constant 0 : index
    %33 = vector.load %arg11[%c0_26, %c0_27] : memref<32x128xf32, #tpu.memory_space<vmem>>, vector<32x128xf32>
    tpu.vector_store %arg11[%c0_26, %c0_27], %32 {strides = array<i32>} : memref<32x128xf32, #tpu.memory_space<vmem>>, vector<32x128xf32>,
    return
  }
  func.func @transform_0(%arg0: i32) -> (i32, i32) {
    %c0_i32 = arith.constant 0 : i32
    %c0_i32_0 = arith.constant 0 : i32
    return %c0_i32, %arg0 : i32, i32
  }
  func.func @transform_1(%arg0: i32) -> (i32, i32) {
    %c0_i32 = arith.constant 0 : i32
    %c0_i32_0 = arith.constant 0 : i32
    %c0_i32_1 = arith.constant 0 : i32
    return %c0_i32, %c0_i32_0 : i32, i32
  }
  func.func @transform_2(%arg0: i32) -> (i32, i32) {
    %c0_i32 = arith.constant 0 : i32
    %c0_i32_0 = arith.constant 0 : i32
    %c0_i32_1 = arith.constant 0 : i32
    return %c0_i32, %c0_i32_0 : i32, i32
  }
  func.func @transform_3(%arg0: i32) -> (i32, i32) {
    %c0_i32 = arith.constant 0 : i32
    %c0_i32_0 = arith.constant 0 : i32
    %c0_i32_1 = arith.constant 0 : i32
    return %c0_i32, %c0_i32_0 : i32, i32
  }
  func.func @transform_4(%arg0: i32) -> (i32, i32) {
    %c0_i32 = arith.constant 0 : i32
    %c0_i32_0 = arith.constant 0 : i32
    %c0_i32_1 = arith.constant 0 : i32
    return %c0_i32, %c0_i32_0 : i32, i32
  }
  func.func @transform_5(%arg0: i32) -> (i32, i32) {
    %c0_i32 = arith.constant 0 : i32
    %c0_i32_0 = arith.constant 0 : i32
    %c0_i32_1 = arith.constant 0 : i32
    return %c0_i32, %c0_i32_0 : i32, i32
  }
  func.func @transform_6(%arg0: i32) -> (i32, i32) {
    %c0_i32 = arith.constant 0 : i32
    %c0_i32_0 = arith.constant 0 : i32
    %c0_i32_1 = arith.constant 0 : i32
    return %c0_i32, %c0_i32_0 : i32, i32
  }
  func.func @transform_7(%arg0: i32) -> (i32, i32) {
    %c0_i32 = arith.constant 0 : i32
    %c0_i32_0 = arith.constant 0 : i32
    %c0_i32_1 = arith.constant 0 : i32
    return %c0_i32, %c0_i32_0 : i32, i32
  }
  func.func @transform_8(%arg0: i32) -> (i32, i32) {
    %c0_i32 = arith.constant 0 : i32
    %c0_i32_0 = arith.constant 0 : i32
    %c0_i32_1 = arith.constant 0 : i32
    return %c0_i32, %c0_i32_0 : i32, i32
  }
  func.func @transform_9(%arg0: i32) -> (i32, i32) {
    %c0_i32 = arith.constant 0 : i32
    %c0_i32_0 = arith.constant 0 : i32
    return %c0_i32, %arg0 : i32, i32
  }
  func.func @transform_10(%arg0: i32) -> (i32, i32) {
    %c0_i32 = arith.constant 0 : i32
    %c0_i32_0 = arith.constant 0 : i32
    return %c0_i32, %arg0 : i32, i32
  }
}

</mosaic_0001>

<bundles_post_ra>
// kernel: dense_autoencoder_forward.1
= control target key start
LH: loop header
LB: loop body
LE: loop exit
PB: predicated region body
PF: predicated region fallthrough
CT: control target
= control target key end

     0   :  { %s1511_s0 = inlined_call_operand.vmem [shape: f32[32,256], index: 0, kind: input, shape index: {}]   ;;  %s1512_s1 = inlined_call_operand.vmem [shape: f32[16,32], index: 1, kind: input, shape index: {}]   ;;  %s1513_s2 = inlined_call_operand.vmem [shape: f32[16,1], index: 2, kind: input, shape index: {}]   ;;  %s1514_s3 = inlined_call_operand.vmem [shape: f32[8,16], index: 3, kind: input, shape index: {}]   ;;  %s1515_s4 = inlined_call_operand.vmem [shape: f32[8,1], index: 4, kind: input, shape index: {}]   ;;  %s1516_s5 = inlined_call_operand.vmem [shape: f32[16,8], index: 5, kind: input, shape index: {}]   ;;  %s1517_s6 = inlined_call_operand.vmem [shape: f32[16,1], index: 6, kind: input, shape index: {}]   ;;  %s1518_s7 = inlined_call_operand.vmem [shape: f32[32,16], index: 7, kind: input, shape index: {}]   ;;  %s1519_s8 = inlined_call_operand.vmem [shape: f32[32,1], index: 8, kind: input, shape index: {}]   ;;  %s1520_s9 = inlined_call_operand.hbm [shape: f32[8,256], index: 9, kind: output, shape index: {0}]   ;;  %s1521_s10 = inlined_call_operand.hbm [shape: f32[32,256], index: 10, kind: output, shape index: {1}]  }
   0x1   :  { %1523 = sst [smem:[#allocation9_spill]] %s1511_s0 }
   0x2   :  { %16 = vsyncpa [#allocation4], 0 }
   0x3   :  { %18 = vsyncpa [#allocation4 + $0x1], 0 }
   0x4   :  { %19 = vsyncpa [#allocation6], 0 }
   0x5   :  { %21 = vsyncpa [#allocation6 + $0x1], 0  ;;  %s1307_s13 = smov 0   ;;  %s1309_s14 = smov 0  }
   0x6   :  { %s1311_s15 = smov 0   ;;  %s1313_s16 = smov 0  }
   0x7 LB: > { %s981_s17 = sadd.s32 4294967295, %s1241_s16   ;;  %s982_s18 = sadd.s32 4294967294, %s1241_s16   ;;  %s1241_s16 = sphi %s1313_s16, %s1531_s16   ;;  %s1237_s15 = sphi %s1311_s15, %s1530_s15   ;;  %s1233_s14 = sphi %s1309_s14, %s1529_s14   ;;  %s1229_s13 = sphi %s1307_s13, %s1528_s13  }
   0x8   : > { %s1330_s19 = sadd.s32 1, %s1241_s16   ;;  %s34_s20 = sadd.s32 1, %s1237_s15 }
   0x9   : > { %s31_s21 = ssub.s32 %s1241_s16, %s1330_s19  ;;  %p41_p0 = scmp.ne.s32.totalorder %s1237_s15, %s1233_s14 }
   0xa   : > { %p32_p1 = scmp.eq.s32.totalorder %s31_s21, 0  ;;  %p42_p2 = scmp.eq.s32.totalorder %s1241_s16, 0 }
   0xb   : > { %p239_p3 = scmp.eq.s32.totalorder %s981_s17, 1  ;;  %p244_p4 = scmp.ne.s32.totalorder %s1233_s14, %s1229_s13 }
   0xc   : > { %s1343_s22 = scalar_select %p32_p1, %s1237_s15, %s34_s20  }
   0xd   : > { %p43_p5 = por %p42_p2, %p41_p0  ;;  %p1345_p6 = por %p239_p3, %p41_p0 }
   0xe   : > { %p245_p7 = scmp.eq.s32.totalorder %s982_s18, 1  ;;  %p984_p9 = scmp.ge.s32.totalorder %s1241_s16, 2 }
  0x10   : > { %p1349_p8 = por %p245_p7, %p244_p4  ;;  %311 = sbr.rel (%p984_p9) target bundleno = 35 (0x23), region = 48 }
  0x17   : > { %314 = sbr.rel (!%p43_p5) target bundleno = 35 (0x23), region = 52  ;;  %s316_s25 = sand.u32 (%p43_p5), 1, %s1237_s15  }
  0x18   : > { %s986_s26 = sshll.u32 (%p43_p5), %s1241_s16, 3  ;;  %s985_s27 = sshll.u32 (%p43_p5), %s316_s25, 5 }
  0x19   : > { %s1526_s0 = sld [smem:[#allocation9_spill]] (%p43_p5)  ;;  %s318_s11 = scalar_lea.vmem (%p43_p5), [#allocation2], %s985_s27 }
  0x1f   : > { %s320_s30 = scalar_lea.vmem %s1526_s0, %s986_s26 }
  0x20   : > { %v354_v0 = vld [vmem:[%s320_s30] sm:$0xff]  ;;  %v356_v1 = vld [vmem:[%s320_s30 + $0x10] sm:$0xff] }
  0x21   : > { %v358_v2 = vld [vmem:[%s320_s30 + $0x20] sm:$0xff]  ;;  %355 = vst [vmem:[%s318_s11] sm:$0xff] %v354_v0  ;;  %357 = vst [vmem:[%s318_s11 + $0x8] sm:$0xff] %v356_v1  ;;  %v360_v3 = vld [vmem:[%s320_s30 + $0x30] sm:$0xff] }
  0x22   : > { %359 = vst [vmem:[%s318_s11 + $0x10] sm:$0xff] %v358_v2  ;;  %361 = vst [vmem:[%s318_s11 + $0x18] sm:$0xff] %v360_v3 }
  0x23 PF: > { %p987_p10 = scmp.ge.s32.totalorder %s1241_s16, 1  ;;  %p366_p11 = scmp.lt.s32.totalorder %s1241_s16, 3 }
  0x25   : > { %p367_p12 = pnand %p987_p10, %p366_p11 }
  0x26   : > { %s1364_s12 = sand.u32 (!%p367_p12), 1, %s1233_s14   ;;  %v419_v4 = vld [vmem:[%s1512_s1] sm:$0xff] (!%p367_p12)  ;;  %vm433_vm0 = vcmask (!%p367_p12), 261120   ;;  %v1243_v6 = vmov (!%p367_p12), 0   ;;  %v422_v7 = vld [vmem:[%s1513_s2 + $0x8] sm:$0xff] (!%p367_p12)  ;;  %v705_v17 = vld [vmem:[%s1519_s8 + $0x18] sm:$0xff] (!%p367_p12) }
  0x27   : > { %370 = sbr.rel (%p367_p12) target bundleno = 974 (0x3ce), region = 90  ;;  %v421_v5 = vld [vmem:[%s1513_s2] sm:$0xff] (!%p367_p12)  ;;  %s1522_s26 = sshll.u32 (!%p367_p12), %s1364_s12, 5  ;;  %1036 = vmatprep.mubr.msk.f32.mxu0 (!%p367_p12), %vm433_vm0, %v419_v4  ;;  %1129 = vset.pattern.permute.xlu0 (!%p367_p12), %v1243_v6  ;;  %v603_v14 = vld [vmem:[%s1517_s6 + $0x8] sm:$0xff] (!%p367_p12)  ;;  %v1244_v18 = vmov (!%p367_p12), 0.0|0.0   ;;  %vm1245_vm1 = vmmov (!%p367_p12), 0  }
  0x28   : > { %425 = vperm.xlu0 (!%p367_p12), %1129, %v421_v5   ;;  %1130 = vset.pattern.permute.xlu1 (!%p367_p12), %v1243_v6  ;;  %s375_s29 = scalar_lea.vmem (!%p367_p12), [#allocation2], %s1522_s26  ;;  %v420_v15 = vld [vmem:[%s1512_s1 + $0x8] sm:$0xff] (!%p367_p12)  ;;  %v1246_v19 = vmov (!%p367_p12), 0.0   ;;  %v518_v20 = vld [vmem:[%s1515_s4] sm:$0xff] (!%p367_p12)  ;;  %v704_v23 = vld [vmem:[%s1519_s8 + $0x10] sm:$0xff] (!%p367_p12)  ;;  %vm524_vm2 = vcmask (!%p367_p12), 130048  }
  0x29   : > { %v415_v8 = vld [vmem:[%s375_s29] sm:$0xff] (!%p367_p12)  ;;  %v416_v9 = vld [vmem:[%s375_s29 + $0x8] sm:$0xff] (!%p367_p12)  ;;  %v417_v10 = vld [vmem:[%s375_s29 + $0x10] sm:$0xff] (!%p367_p12)  ;;  %1069 = vmatprep.subr.bf16.mxu1 (!%p367_p12), %v1244_v18  ;;  %1043 = vmatprep.mubr.msk.f32.mxu1 (!%p367_p12), %vm1245_vm1, %v1246_v19  ;;  %vm614_vm3 = vcmask (!%p367_p12), 64512   ;;  %s989_s18 = sshll.u32 (!%p367_p12), %s1364_s12, 3  ;;  %s1433_s27 = sshll.u32 (!%p367_p12), %s981_s17, 7 }
  0x2a   : > { %v1061_v11 = vpack.c.bf16 (!%p367_p12), %v416_v9, %v415_v8  ;;  %v418_v12 = vld [vmem:[%s375_s29 + $0x18] sm:$0xff] (!%p367_p12)  ;;  %v703_v16 = vld [vmem:[%s1519_s8 + $0x8] sm:$0xff] (!%p367_p12)  ;;  %521 = vperm.xlu1 (!%p367_p12), %1130, %v518_v20   ;;  %v602_v21 = vld [vmem:[%s1517_s6] sm:$0xff] (!%p367_p12)  ;;  %s407_s25 = scalar_lea.vmem (!%p367_p12), [#allocation3], %s989_s18  ;;  %s1439_s26 = scalar_lea.hbm (!%p367_p12), %s1520_s9, %s1433_s27 }
  0x2b   : > { %v1065_v13 = vpack.c.bf16 (!%p367_p12), %v418_v12, %v417_v10  ;;  %v702_v22 = vld [vmem:[%s1519_s8] sm:$0xff] (!%p367_p12)  ;;  %v601_v40 = vld [vmem:[%s1516_s5 + $0x8] sm:$0xff] (!%p367_p12)  ;;  %v700_v42 = vld [vmem:[%s1518_s7 + $0x10] sm:$0xff] (!%p367_p12)  ;;  %s870_s28 = sshll.u32 (!%p367_p12), %s407_s25, 4  ;;  %s852_s11 = scalar_lea.sflag (!%p367_p12), [#allocation4], %s1364_s12  ;;  %s871_s28 = int_to_ptr.vmem [resolvable:$true] %s870_s28 }
  0x2c   : > { %1062 = vmatprep.subr.bf16.mxu0 (!%p367_p12), %v1061_v11  ;;  %430 = vperm.xlu0 (!%p367_p12), %1129, %v422_v7   ;;  %v517_v33 = vld [vmem:[%s1514_s3] sm:$0xff] (!%p367_p12)  ;;  %v699_v52 = vld [vmem:[%s1518_s7 + $0x8] sm:$0xff] (!%p367_p12)  ;;  %v701_v53 = vld [vmem:[%s1518_s7 + $0x18] sm:$0xff] (!%p367_p12)  ;;  %s1147_s18 = scalar_lea.vmem (!%p367_p12), %s871_s28, 128  ;;  %s1247_s20 = smov (!%p367_p12), [#allocation3]  }
  0x2d   : > { %1064 = vmatpush3.bf16.msra.mxu0 (!%p367_p12), %v1061_v11  ;;  %v600_v34 = vld [vmem:[%s1516_s5] sm:$0xff] (!%p367_p12)  ;;  %p1148_p13 = scmp.ne.s32.totalorder (!%p367_p12), %s871_s28, %s1147_s18  ;;  %s1151_s21 = sshll.u32 (!%p367_p12), %s1247_s20, 4  ;;  %s1152_s21 = int_to_ptr.vmem [resolvable:$false] %s1151_s21 }
  0x2e   : > { %1066 = vmatprep.subr.bf16.mxu0 %v1065_v13  ;;  %606 = vperm.xlu1 %1130, %v602_v21   ;;  %v698_v41 = vld [vmem:[%s1518_s7] sm:$0xff]  ;;  %s1153_s0 = scalar_lea.vmem %s1152_s21, 256  ;;  %p1154_p2 = scmp.lt.s32.totalorder %s871_s28, %s1152_s21 }
  0x2f   : > { %p1149_p0 = pnand %p1148_p13, %p1345_p6  ;;  %p1155_p3 = scmp.lt.s32.totalorder %s1153_s0, %s1147_s18 }
  0x30   : > { %611 = vperm.xlu0 %1129, %v603_v14  }
  0x31   : > { %1068 = vmatpush3.bf16.msra.mxu0 %v1065_v13  ;;  %p1150_p1 = pneg %p1149_p0  ;;  %p1156_p4 = por %p1155_p3, %p1154_p2 }
  0x32   : > { %708 = vperm.xlu1 %1130, %v702_v22  }
  0x33   : > { %p1157_p5 = pnand %p1156_p4, %p1150_p1 }
  0x34   : > { %1037 = vmatmul.mubr.msk.f32.vlgmr.msra.gmra.mrb[0].mxu0 %vm433_vm0, %v420_v15  ;;  %713 = vperm.xlu0 %1129, %v703_v16  }
  0x35   : > { %1055 = vmatprep.mubr.msk.f32.mxu0 %vm524_vm2, %v698_v41 }
  0x36   : > { %718 = vperm.xlu1 %1130, %v704_v23  }
  0x38   : > { %723 = vperm.xlu0 %1129, %v705_v17  }
  0xa7   : > { %v426_v24 = vpop.permute.xlu0 %425 }
  0xa9   : > { %v522_v35 = vpop.permute.xlu1 %521 }
  0xab   : > { %v431_v25 = vpop.permute.xlu0 %430 }
  0xad   : > { %v607_v45 = vpop.permute.xlu1 %606 }
  0xaf   : > { %v612_v43 = vpop.permute.xlu0 %611 }
 0x107   : > { %v1038_v26 = vpop.f32.mrb[0].mxu0 }
 0x108   : > { %v512_v27 = vadd.f32 %v1038_v26, %v431_v25  ;;  %v506_v28 = vpop.f32.mrb[1].mxu0 }
 0x109   : > { %v507_v29 = vadd.f32 %v506_v28, %v426_v24 }
 0x10a   : > { %v516_v30 = vmax.f32 %v512_v27, 0.0 }
 0x10b   : > { %v515_v31 = vmax.f32 %v507_v29, 0.0 }
 0x10d   : > { %v1070_v32 = vpack.c.bf16 %v516_v30, %v515_v31 }
 0x10f   : > { %1071 = vmatpush3.bf16.msra.mxu1 %v1070_v32 }
 0x112   : > { %1044 = vmatmul.mubr.msk.f32.vlgmr.msra.gmra.mrb[0].mxu1 %vm524_vm2, %v517_v33 }
 0x113   : > { %1048 = vmatprep.mubr.msk.f32.mxu1 %vm614_vm3, %v600_v34 }
 0x1e5   : > { %v594_v36 = vpop.f32.mrb[0].mxu1 }
 0x1e6   : > { %v595_v37 = vadd.f32 %v594_v36, %v522_v35  ;;  %v1045_v38 = vpop.f32.mrb[1].mxu1 }
 0x1e8   : > { %v598_v39 = vmax.f32 %v595_v37, 0.0 }
 0x1ea   : > { %1046 = vmatprep.subr.mxu1 %v598_v39  ;;  %599 = vst [vmem:[%s407_s25] sm:$0xff] %v598_v39 }
 0x1eb   : > { %1047 = vmatpush3.msra.mxu1 %v598_v39 }
 0x1ec   : > { %1049 = vmatmul.mubr.msk.f32.vlgmr.msra.gmra.mrb[2].mxu1 %vm614_vm3, %v601_v40 }
 0x1ed   : > { %1058 = vmatprep.mubr.msk.f32.mxu1 %vm524_vm2, %v700_v42 }
 0x2bf   : > { %v1050_v44 = vpop.f32.mrb[2].mxu1 }
 0x2c0   : > { %v693_v46 = vadd.f32 %v1050_v44, %v612_v43  ;;  %v687_v47 = vpop.f32.mrb[3].mxu1 }
 0x2c1   : > { %v688_v48 = vadd.f32 %v687_v47, %v607_v45 }
 0x2c2   : > { %v697_v49 = vmax.f32 %v693_v46, 0.0 }
 0x2c3   : > { %v696_v50 = vmax.f32 %v688_v48, 0.0 }
 0x2c5   : > { %v1072_v51 = vpack.c.bf16 %v697_v49, %v696_v50 }
 0x2c7   : > { %1073 = vmatprep.subr.bf16.mxu0 %v1072_v51  ;;  %1076 = vmatprep.subr.bf16.mxu1 %v1072_v51 }
 0x2c8   : > { %1075 = vmatpush3.bf16.msra.mxu0 %v1072_v51  ;;  %1077 = vmatpush3.bf16.msra.mxu1 %v1072_v51 }
 0x2cb   : > { %1056 = vmatmul.mubr.msk.f32.vlgmr.msra.gmra.mrb[2].mxu0 %vm524_vm2, %v699_v52  ;;  %1059 = vmatmul.mubr.msk.f32.vlgmr.msra.gmra.mrb[4].mxu1 %vm524_vm2, %v701_v53 }
 0x2cc   : > { %1160 = shalt.err (!%p1157_p5)
}
 0x2cd   : > { %s1161_s17 = scalar_lea.hbm %s1439_s26, 128  ;;  %s1165_s30 = scalar_lea.hbm %s1520_s9, 256 }
 0x2ce   : > { %p1162_p7 = scmp.ne.s32.totalorder %s1439_s26, %s1161_s17  ;;  %p1166_p12 = scmp.lt.u32.totalorder %s1439_s26, %s1520_s9 }
 0x2cf   : > { %p1167_p13 = scmp.lt.u32.totalorder %s1165_s30, %s1161_s17  ;;  %p1169_p1 = scmp.lt.u32.totalorder %s1161_s17, %s1439_s26 }
 0x2d0   : > { %p1163_p10 = pnand %p1162_p7, %p1345_p6 }
 0x2d1   : > { %p1168_p0 = por %p1167_p13, %p1166_p12 }
 0x2d2   : > { %p1164_p11 = pneg %p1163_p10 }
 0x2d3   : > { %p1170_p2 = por %p1169_p1, %p1168_p0 }
 0x2d5   : > { %p1171_p3 = pnand %p1170_p2, %p1164_p11 }
 0x2d7   : > { %1174 = shalt.err (!%p1171_p3)
}
 0x2d8   : > { %1078 = dma.vmem_to_hbm [thread:$0]  (%p1345_p6), %s871_s28, 128, %s1439_s26, %s852_s11   ;;  %v714_v54 = vpop.permute.xlu0 %713  ;;  %v709_v55 = vpop.permute.xlu1 %708 }
 0x2d9   : > { %s1527_s0 = sshll.u32 %s1364_s12, 5  ;;  %s1467_s17 = scalar_lea.hbm %s1521_s10, %s1433_s27 }
 0x2da   : > { %s414_s26 = scalar_lea.vmem [#allocation5], %s1527_s0  ;;  %s857_s25 = scalar_lea.sflag [#allocation6], %s1364_s12 }
 0x2db   : > { %s882_s28 = sshll.u32 %s414_s26, 4  ;;  %s1248_s30 = smov [#allocation5]   ;;  %s1461_s28 = int_to_ptr.vmem [resolvable:$true] %s882_s28 }
 0x2dc   : > { %v724_v56 = vpop.permute.xlu0 %723  ;;  %v719_v57 = vpop.permute.xlu1 %718  ;;  %s1175_s29 = scalar_lea.vmem %s1461_s28, 512  ;;  %s1179_s20 = sshll.u32 %s1248_s30, 4  ;;  %s1180_s20 = int_to_ptr.vmem [resolvable:$false] %s1179_s20 }
 0x2dd   : > { %p1176_p4 = scmp.ne.s32.totalorder %s1461_s28, %s1175_s29  ;;  %s1181_s21 = scalar_lea.vmem %s1180_s20, 1024 }
 0x2de   : > { %p1182_p10 = scmp.lt.s32.totalorder %s1461_s28, %s1180_s20  ;;  %p1183_p11 = scmp.lt.s32.totalorder %s1181_s21, %s1175_s29 }
 0x2df   : > { %p1177_p5 = pnand %p1176_p4, %p1345_p6 }
 0x2e0   : > { %p1184_p12 = por %p1183_p11, %p1182_p10 }
 0x2e1   : > { %p1178_p7 = pneg %p1177_p5 }
 0x2e3   : > { %p1185_p13 = pnand %p1184_p12, %p1178_p7 }
 0x39e   : > { %v1057_v58 = vpop.f32.mrb[2].mxu0  ;;  %v1060_v59 = vpop.f32.mrb[4].mxu1 }
 0x39f   : > { %v810_v60 = vadd.f32 %v1057_v58, %v714_v54  ;;  %v820_v61 = vadd.f32 %v1060_v59, %v724_v56  ;;  %v804_v62 = vpop.f32.mrb[3].mxu0  ;;  %v814_v63 = vpop.f32.mrb[5].mxu1 }
 0x3a0   : > { %v805_v0 = vadd.f32 %v804_v62, %v709_v55  ;;  %v815_v1 = vadd.f32 %v814_v63, %v719_v57 }
 0x3a1   : > { %v1001_v2 = vmul.f32 -1.442695, %v810_v60  ;;  %v1003_v3 = vmul.f32 -1.442695, %v820_v61 }
 0x3a2   : > { %v1000_v4 = vmul.f32 -1.442695, %v805_v0  ;;  %v1002_v5 = vmul.f32 -1.442695, %v815_v1 }
 0x3a3   : > { %1131 = vpow2.f32 %v1001_v2 }
 0x3a4   : > { %1133 = vpow2.f32 %v1003_v3 }
 0x3a5   : > { %1135 = vpow2.f32 %v1000_v4 }
 0x3a6   : > { %1137 = vpow2.f32 %v1002_v5 }
 0x3ad   : > { %v1132_v6 = vpop.eup %1131 }
 0x3ae   : > { %v1134_v7 = vpop.eup %1133  ;;  %v836_v8 = vadd.f32 1.0, %v1132_v6 }
 0x3af   : > { %v1136_v9 = vpop.eup %1135  ;;  %v838_v10 = vadd.f32 1.0, %v1134_v7 }
 0x3b0   : > { %v1138_v11 = vpop.eup %1137  ;;  %1139 = vrcp.f32 %v836_v8  ;;  %v835_v12 = vadd.f32 1.0, %v1136_v9 }
 0x3b1   : > { %1141 = vrcp.f32 %v838_v10  ;;  %v837_v13 = vadd.f32 1.0, %v1138_v11 }
 0x3b2   : > { %1143 = vrcp.f32 %v835_v12 }
 0x3b3   : > { %1145 = vrcp.f32 %v837_v13 }
 0x3ba   : > { %v1140_v14 = vpop.eup %1139 }
 0x3bb   : > { %v1142_v15 = vpop.eup %1141  ;;  %848 = vst [vmem:[%s414_s26 + $0x8] sm:$0xff] %v1140_v14 }
 0x3bc   : > { %v1144_v16 = vpop.eup %1143  ;;  %850 = vst [vmem:[%s414_s26 + $0x18] sm:$0xff] %v1142_v15 }
 0x3bd   : > { %v1146_v17 = vpop.eup %1145  ;;  %847 = vst [vmem:[%s414_s26] sm:$0xff] %v1144_v16 }
 0x3be   : > { %849 = vst [vmem:[%s414_s26 + $0x10] sm:$0xff] %v1146_v17 }
 0x3bf   : > { %1188 = shalt.err (!%p1185_p13)
}
 0x3c0   : > { %s1189_s27 = scalar_lea.hbm %s1467_s17, 512  ;;  %s1193_s11 = scalar_lea.hbm %s1521_s10, 1024 }
 0x3c1   : > { %p1190_p0 = scmp.ne.s32.totalorder %s1467_s17, %s1189_s27  ;;  %p1194_p3 = scmp.lt.u32.totalorder %s1467_s17, %s1521_s10 }
 0x3c2   : > { %p1195_p4 = scmp.lt.u32.totalorder %s1193_s11, %s1189_s27  ;;  %p1197_p7 = scmp.lt.u32.totalorder %s1189_s27, %s1467_s17 }
 0x3c3   : > { %p1191_p1 = pnand %p1190_p0, %p1345_p6 }
 0x3c4   : > { %p1196_p5 = por %p1195_p4, %p1194_p3 }
 0x3c5   : > { %p1192_p2 = pneg %p1191_p1 }
 0x3c6   : > { %p1198_p10 = por %p1197_p7, %p1196_p5 }
 0x3c8   : > { %p1199_p11 = pnand %p1198_p10, %p1192_p2 }
 0x3ca   : > { %1202 = shalt.err (!%p1199_p11)
}
 0x3cb   : > { %s1249_s29 = smov 128   ;;  %s1250_s20 = smov 256  }
 0x3cc   : > { %s1251_s21 = smov 8  }
 0x3cd   : > { %1079 = dma.vmem_to_hbm [thread:$0]  (%p1345_p6), %s1461_s28, 512, %s1467_s17, %s857_s25, %s1249_s29, %s1250_s20, %s1251_s21  }
 0x3ce PF: > { %s897_s0 = sand.u32 1, %s1229_s13   ;;  %p1083_p12 = pnand %p984_p9, %p1349_p8 }
 0x3cf   : > { %s898_s27 = scalar_lea.sflag [#allocation4], %s897_s0 }
 0x3d0   : > { %1220 = dma.done.wait (!%p1083_p12), %s898_s27, 128  }
 0x3d1   : > { %1222 = vsyncadd (!%p1083_p12), %s898_s27, 4294967168  ;;  %s907_s26 = scalar_lea.sflag [#allocation6], %s897_s0 }
 0x3d2   : > { %1224 = dma.done.wait (!%p1083_p12), %s907_s26, 512  }
 0x3d3   : > { %1226 = vsyncadd (!%p1083_p12), %s907_s26, 4294966784  ;;  %p24_p6 = scmp.ge.s32.totalorder %s1330_s19, 4   ;;  %s1528_s13 = smov %s1233_s14 }
 0x3d4   : > { %s1529_s14 = smov %s1237_s15  ;;  %s1530_s15 = smov %s1343_s22 }
 0x3d5   : > { %s1531_s16 = smov %s1330_s19  ;;  %26 = sbr.rel (!%p24_p6) target bundleno = 7 (0x7), region = 151 }
 0x3dc   :  { %912 = vsyncpa [#allocation4], 1 }
 0x3dd   :  { %914 = vsyncpa [#allocation4 + $0x1], 1 }
 0x3de   :  { %915 = vsyncpa [#allocation6], 1 }
 0x3df   :  { %917 = vsyncpa [#allocation6 + $0x1], 1 }

</bundles_post_ra>
